<compile_context>
chip_gen: v5e
topology: v5e:2x2
jax: 0.10.0
libtpu: 0.0.40
codegen_flags: <defaults>
</compile_context>

<pallas_src>
import functools

import jax
import jax.numpy as jnp
from jax.experimental import pallas as pl
from jax.experimental.pallas import tpu as pltpu


def _round_up(v, m):
    return ((v + m - 1) // m) * m


def temporal_block_kernel(x_ref, w1_ref, w2_ref, wd_ref, b_ref, o_ref,
                          xpad_ref, hpad_ref, *, K, dil, pad, LP, TpB):
    """One batch block per grid step.

    x_ref    : (Cin, TpB)       x block: column t = x[:, t] for t < T, zeros after
    w1_ref   : (K, Cout, Cin)   conv1 tap matrices (resident across the grid)
    w2_ref   : (K, Cout, Cout)  conv2 tap matrices
    wd_ref   : (Cout, Cin)      1x1 downsample
    b_ref    : (3, Cout, 1)     f32 biases [b1, b2, bd]
    o_ref    : (Cout, TpB)      output block; column t valid for t < T
    xpad_ref : (Cin,  LP+TpB)   scratch slab: [:, :LP] zeros, [:, LP:] = x
    hpad_ref : (Cout, LP+TpB)   scratch slab: [:, :LP] zeros, [:, LP:] = h1
    The LP (>= pad, multiple of 128) zero region IS the causal left padding, so
    all tap reads are plain static slices (no rolls / concats / masks).
    """
    x = x_ref[...]                                               # (Cin, TpB)

    # --- causally padded x slab (rebuilt every step -> megacore-safe) --------
    xpad_ref[:, :LP] = jnp.zeros((xpad_ref.shape[0], LP), xpad_ref.dtype)
    xpad_ref[:, LP:] = x
    xp = xpad_ref[...]                                           # (Cin, LP+TpB)

    # --- conv1: K accumulating MXU matmuls over static tap slices ------------
    acc1 = jnp.dot(w1_ref[0], xp[:, LP - pad:LP - pad + TpB],
                   preferred_element_type=jnp.float32)
    for k in range(1, K):
        off = LP - pad + k * dil
        acc1 = acc1 + jnp.dot(w1_ref[k], xp[:, off:off + TpB],
                              preferred_element_type=jnp.float32)
    h1 = jnp.maximum(acc1 + b_ref[0], 0.0)                       # (Cout, TpB) f32

    # --- causally padded h1 slab (zero region = conv2's causal padding) ------
    hpad_ref[:, :LP] = jnp.zeros((hpad_ref.shape[0], LP), hpad_ref.dtype)
    hpad_ref[:, LP:] = h1.astype(hpad_ref.dtype)
    hp = hpad_ref[...]                                           # (Cout, LP+TpB)

    # --- conv2: K accumulating MXU matmuls ------------------------------------
    acc2 = jnp.dot(w2_ref[0], hp[:, LP - pad:LP - pad + TpB],
                   preferred_element_type=jnp.float32)
    for k in range(1, K):
        off = LP - pad + k * dil
        acc2 = acc2 + jnp.dot(w2_ref[k], hp[:, off:off + TpB],
                              preferred_element_type=jnp.float32)
    h2 = jnp.maximum(acc2 + b_ref[1], 0.0)

    # --- residual 1x1 downsample + final ReLU; one lane-dense store ----------
    res = jnp.dot(wd_ref[...], x, preferred_element_type=jnp.float32) + b_ref[2]
    o_ref[...] = jnp.maximum(h2 + res, 0.0).astype(o_ref.dtype)


def pack_params(params, *, kernel_size, compute_dtype=jnp.float32):
    """One-time parameter packing (hoisted out of the per-call path)."""
    K = kernel_size
    # tap-major weight stacks: W[k] is the (Cout, Cin)/(Cout, Cout) tap matrix
    W1 = jnp.transpose(params["W1"], (2, 0, 1)).astype(compute_dtype)   # (K, Cout, Cin)
    W2 = jnp.transpose(params["W2"], (2, 0, 1)).astype(compute_dtype)   # (K, Cout, Cout)
    Wd = params["Wd"][:, :, 0].astype(compute_dtype)                    # (Cout, Cin)
    b_all = jnp.stack([params["b1"], params["b2"], params["bd"]]
                      ).astype(jnp.float32)[:, :, None]                 # (3, Cout, 1)
    return dict(W1=W1, W2=W2, Wd=Wd, b=b_all)


def temporal_block(x, packed, *, kernel_size, dilation,
                   compute_dtype=jnp.float32):
    """x: (B, Cin, T) float32; packed = pack_params(...). Returns (B, Cout, T)."""
    B, Cin, T = x.shape
    K, dil = kernel_size, dilation
    pad = (K - 1) * dil                      # causal padding == Chomp1d size
    Cout = packed["W1"].shape[1]
    TpB = _round_up(T, 128)                  # lane-dense per-batch column block
    LP = _round_up(max(pad, 1), 128)         # left zero region of the VMEM slabs

    # per-call host work: only x packing (right-pad time, batch-major blocks)
    xb = jnp.pad(x, ((0, 0), (0, 0), (0, TpB - T))).astype(compute_dtype)
    xb = jnp.transpose(xb, (1, 0, 2)).reshape(Cin, B * TpB)      # (Cin, B*TpB)

    kernel = functools.partial(temporal_block_kernel, K=K, dil=dil, pad=pad,
                               LP=LP, TpB=TpB)

    o_flat = pl.pallas_call(
        kernel,
        out_shape=jax.ShapeDtypeStruct((Cout, B * TpB), jnp.float32),
        grid=(B,),                                               # per-batch tiles
        in_specs=[
            pl.BlockSpec((Cin, TpB), lambda b: (0, b)),          # x block
            pl.BlockSpec((K, Cout, Cin), lambda b: (0, 0, 0)),   # resident weights
            pl.BlockSpec((K, Cout, Cout), lambda b: (0, 0, 0)),
            pl.BlockSpec((Cout, Cin), lambda b: (0, 0)),
            pl.BlockSpec((3, Cout, 1), lambda b: (0, 0, 0)),     # biases (f32)
        ],
        out_specs=pl.BlockSpec((Cout, TpB), lambda b: (0, b)),
        scratch_shapes=[
            pltpu.VMEM((Cin, LP + TpB), compute_dtype),          # padded x slab
            pltpu.VMEM((Cout, LP + TpB), compute_dtype),         # padded h1 slab
        ],
        compiler_params=pltpu.CompilerParams(
            dimension_semantics=("parallel",),                   # megacore on v7x
            vmem_limit_bytes=32 * 1024 * 1024),
    )(xb, packed["W1"], packed["W2"], packed["Wd"], packed["b"])

    # drop per-batch lane-padding columns, back to PyTorch layout (B, Cout, T)
    o = o_flat.reshape(Cout, B, TpB)[:, :, :T]
    return jnp.transpose(o, (1, 0, 2))


def make_params(key, Cin, Cout, K):
    """Deterministic synthetic parameters matching the PyTorch module's shapes.

    weight_norm reparam: W = g * v / ||v|| (norm over dims (1,2) per out-channel);
    PyTorch initializes g = ||v||, so the effective weight equals v at init.
    """
    ks = jax.random.split(key, 6)

    def wn(v):
        nrm = jnp.sqrt(jnp.sum(v * v, axis=(1, 2), keepdims=True))
        g = nrm
        return g * v / nrm

    v1 = 0.01 * jax.random.normal(ks[0], (Cout, Cin, K), jnp.float32)
    W1 = wn(v1)
    b1 = jax.random.uniform(ks[1], (Cout,), jnp.float32, -1.0, 1.0) / jnp.sqrt(Cin * K)

    v2 = 0.01 * jax.random.normal(ks[2], (Cout, Cout, K), jnp.float32)
    W2 = wn(v2)
    b2 = jax.random.uniform(ks[3], (Cout,), jnp.float32, -1.0, 1.0) / jnp.sqrt(Cout * K)

    Wd = 0.01 * jax.random.normal(ks[4], (Cout, Cin, 1), jnp.float32)
    bd = jax.random.uniform(ks[5], (Cout,), jnp.float32, -1.0, 1.0) / jnp.sqrt(Cin * 1)

    return dict(W1=W1, b1=b1, W2=W2, b2=b2, Wd=Wd, bd=bd)


def torch_ref(x, params, *, kernel_size, dilation):
    """Pure-JAX mirror of the PyTorch forward (pad both sides -> Chomp1d)."""
    K, dil = kernel_size, dilation
    pad = (K - 1) * dil

    def conv_chomp(xx, W, b):
        y = jax.lax.conv_general_dilated(
            xx, W, window_strides=(1,), padding=[(pad, pad)],
            rhs_dilation=(dil,), dimension_numbers=("NCH", "OIH", "NCH"))
        y = y + b[None, :, None]
        return y[:, :, :-pad] if pad > 0 else y                  # Chomp1d

    h1 = jax.nn.relu(conv_chomp(x, params["W1"], params["b1"]))
    h2 = jax.nn.relu(conv_chomp(h1, params["W2"], params["b2"]))
    res = jax.lax.conv_general_dilated(
        x, params["Wd"], (1,), [(0, 0)],
        dimension_numbers=("NCH", "OIH", "NCH")) + params["bd"][None, :, None]
    return jax.nn.relu(h2 + res)


if __name__ == "__main__":
    # TemporalBlock(n_inputs=4, n_outputs=8, kernel_size=3, stride=1,
    #               dilation=2, dropout=0.0, causal=True)
    B, Cin, Cout, T = 2, 4, 8, 16
    K, dil = 3, 2

    key = jax.random.PRNGKey(0)
    kx, kp = jax.random.split(key)
    x = jax.random.normal(kx, (B, Cin, T), jnp.float32)
    params = make_params(kp, Cin, Cout, K)

    ref = torch_ref(x, params, kernel_size=K, dilation=dil)

    # float32 path: strict parity with the reference.
    packed = pack_params(params, kernel_size=K)                  # packed once
    fwd = jax.jit(functools.partial(temporal_block, kernel_size=K, dilation=dil))
    out = jax.block_until_ready(fwd(x, packed))
    assert out.shape == (B, Cout, T), out.shape
    assert jnp.allclose(out, ref, atol=1e-5, rtol=1e-5), \
        float(jnp.max(jnp.abs(out - ref)))

    # bf16 MXU path (f32 accumulation): loose tolerance sanity check.
    packed_bf16 = pack_params(params, kernel_size=K, compute_dtype=jnp.bfloat16)
    fwd_bf16 = jax.jit(functools.partial(temporal_block, kernel_size=K,
                                         dilation=dil,
                                         compute_dtype=jnp.bfloat16))
    out_bf16 = jax.block_until_ready(fwd_bf16(x, packed_bf16))
    assert out_bf16.shape == (B, Cout, T), out_bf16.shape
    assert jnp.allclose(out_bf16, ref, atol=5e-2, rtol=5e-2), \
        float(jnp.max(jnp.abs(out_bf16 - ref)))

    print("KERNEL_OK")
</pallas_src>

<mosaic_0001>
module attributes {stable_mosaic.version = 11 : i64} {
  func.func @temporal_block_kernel(%arg0: i32, %arg1: memref<4x128xf32, #tpu.memory_space<vmem>>, %arg2: memref<3x8x4xf32, #tpu.memory_space<vmem>>, %arg3: memref<3x8x8xf32, #tpu.memory_space<vmem>>, %arg4: memref<8x4xf32, #tpu.memory_space<vmem>>, %arg5: memref<3x8x1xf32, #tpu.memory_space<vmem>>, %arg6: memref<8x128xf32, #tpu.memory_space<vmem>>, %arg7: memref<4x256xf32, #tpu.memory_space<vmem>>, %arg8: memref<8x256xf32, #tpu.memory_space<vmem>>) attributes {dimension_semantics = [#tpu.dimension_semantics<parallel>], iteration_bounds = array<i64: 2>, scalar_prefetch = 0 : i64, scratch_operands = 2 : i64, tpu.core_type = #tpu.core_type<tc>, window_params = [{transform_indices = @transform_0, window_bounds = array<i64: 4, 128>}, {pipeline_mode = #tpu.pipeline_mode<synchronous>, transform_indices = @transform_1, window_bounds = array<i64: 3, 8, 4>}, {pipeline_mode = #tpu.pipeline_mode<synchronous>, transform_indices = @transform_2, window_bounds = array<i64: 3, 8, 8>}, {pipeline_mode = #tpu.pipeline_mode<synchronous>, transform_indices = @transform_3, window_bounds = array<i64: 8, 4>}, {pipeline_mode = #tpu.pipeline_mode<synchronous>, transform_indices = @transform_4, window_bounds = array<i64: 3, 8, 1>}, {transform_indices = @transform_5, window_bounds = array<i64: 8, 128>}]} {
    %c0 = arith.constant 0 : index
    %c0_0 = arith.constant 0 : index
    %0 = vector.load %arg1[%c0, %c0_0] : memref<4x128xf32, #tpu.memory_space<vmem>>, vector<4x128xf32>
    %cst = arith.constant 0.000000e+00 : f32
    %1 = vector.broadcast %cst : f32 to vector<4x128xf32>
    %c0_1 = arith.constant 0 : index
    %c0_2 = arith.constant 0 : index
    %2 = vector.load %arg7[%c0_1, %c0_2] : memref<4x256xf32, #tpu.memory_space<vmem>>, vector<4x128xf32>
    tpu.vector_store %arg7[%c0_1, %c0_2], %1 {strides = array<i32>} : memref<4x256xf32, #tpu.memory_space<vmem>>, vector<4x128xf32>,
    %c0_3 = arith.constant 0 : index
    %c128 = arith.constant 128 : index
    %3 = vector.load %arg7[%c0_3, %c128] : memref<4x256xf32, #tpu.memory_space<vmem>>, vector<4x128xf32>
    tpu.vector_store %arg7[%c0_3, %c128], %0 {strides = array<i32>} : memref<4x256xf32, #tpu.memory_space<vmem>>, vector<4x128xf32>,
    %c0_4 = arith.constant 0 : index
    %c0_5 = arith.constant 0 : index
    %4 = vector.load %arg7[%c0_4, %c0_5] : memref<4x256xf32, #tpu.memory_space<vmem>>, vector<4x256xf32>
    %c0_6 = arith.constant 0 : index
    %c0_7 = arith.constant 0 : index
    %c0_8 = arith.constant 0 : index
    %5 = vector.load %arg2[%c0_6, %c0_7, %c0_8] : memref<3x8x4xf32, #tpu.memory_space<vmem>>, vector<1x8x4xf32>
    %6 = vector.shape_cast %5 : vector<1x8x4xf32> to vector<8x4xf32>
    %7 = vector.extract_strided_slice %4 {offsets = [0, 124], sizes = [4, 128], strides = [1, 1]} : vector<4x256xf32> to vector<4x128xf32>
    %cst_9 = arith.constant dense<0.000000e+00> : vector<8x128xf32>
    %8 = tpu.matmul %6, %7, %cst_9 {dimension_numbers = #tpu.dot_dimension_numbers<[1], [0], [0], [1], [0, 0, 1, 1], [], []>} : vector<8x4xf32>, vector<4x128xf32>, vector<8x128xf32> -> vector<8x128xf32>
    %c1 = arith.constant 1 : index
    %c0_10 = arith.constant 0 : index
    %c0_11 = arith.constant 0 : index
    %9 = vector.load %arg2[%c1, %c0_10, %c0_11] : memref<3x8x4xf32, #tpu.memory_space<vmem>>, vector<1x8x4xf32>
    %10 = vector.shape_cast %9 : vector<1x8x4xf32> to vector<8x4xf32>
    %11 = vector.extract_strided_slice %4 {offsets = [0, 126], sizes = [4, 128], strides = [1, 1]} : vector<4x256xf32> to vector<4x128xf32>
    %cst_12 = arith.constant dense<0.000000e+00> : vector<8x128xf32>
    %12 = tpu.matmul %10, %11, %cst_12 {dimension_numbers = #tpu.dot_dimension_numbers<[1], [0], [0], [1], [0, 0, 1, 1], [], []>} : vector<8x4xf32>, vector<4x128xf32>, vector<8x128xf32> -> vector<8x128xf32>
    %13 = arith.addf %8, %12 : vector<8x128xf32>
    %c2 = arith.constant 2 : index
    %c0_13 = arith.constant 0 : index
    %c0_14 = arith.constant 0 : index
    %14 = vector.load %arg2[%c2, %c0_13, %c0_14] : memref<3x8x4xf32, #tpu.memory_space<vmem>>, vector<1x8x4xf32>
    %15 = vector.shape_cast %14 : vector<1x8x4xf32> to vector<8x4xf32>
    %16 = vector.extract_strided_slice %4 {offsets = [0, 128], sizes = [4, 128], strides = [1, 1]} : vector<4x256xf32> to vector<4x128xf32>
    %cst_15 = arith.constant dense<0.000000e+00> : vector<8x128xf32>
    %17 = tpu.matmul %15, %16, %cst_15 {dimension_numbers = #tpu.dot_dimension_numbers<[1], [0], [0], [1], [0, 0, 1, 1], [], []>} : vector<8x4xf32>, vector<4x128xf32>, vector<8x128xf32> -> vector<8x128xf32>
    %18 = arith.addf %13, %17 : vector<8x128xf32>
    %c0_16 = arith.constant 0 : index
    %c0_17 = arith.constant 0 : index
    %c0_18 = arith.constant 0 : index
    %19 = vector.load %arg5[%c0_16, %c0_17, %c0_18] : memref<3x8x1xf32, #tpu.memory_space<vmem>>, vector<1x8x1xf32>
    %20 = vector.shape_cast %19 : vector<1x8x1xf32> to vector<8x1xf32>
    %21 = vector.broadcast %20 : vector<8x1xf32> to vector<8x128xf32>
    %22 = arith.addf %18, %21 : vector<8x128xf32>
    %cst_19 = arith.constant 0.000000e+00 : f32
    %23 = vector.broadcast %cst_19 : f32 to vector<8x128xf32>
    %24 = arith.maximumf %22, %23 : vector<8x128xf32>
    %cst_20 = arith.constant 0.000000e+00 : f32
    %25 = vector.broadcast %cst_20 : f32 to vector<8x128xf32>
    %c0_21 = arith.constant 0 : index
    %c0_22 = arith.constant 0 : index
    %26 = vector.load %arg8[%c0_21, %c0_22] : memref<8x256xf32, #tpu.memory_space<vmem>>, vector<8x128xf32>
    tpu.vector_store %arg8[%c0_21, %c0_22], %25 {strides = array<i32>} : memref<8x256xf32, #tpu.memory_space<vmem>>, vector<8x128xf32>,
    %c0_23 = arith.constant 0 : index
    %c128_24 = arith.constant 128 : index
    %27 = vector.load %arg8[%c0_23, %c128_24] : memref<8x256xf32, #tpu.memory_space<vmem>>, vector<8x128xf32>
    tpu.vector_store %arg8[%c0_23, %c128_24], %24 {strides = array<i32>} : memref<8x256xf32, #tpu.memory_space<vmem>>, vector<8x128xf32>,
    %c0_25 = arith.constant 0 : index
    %c0_26 = arith.constant 0 : index
    %28 = vector.load %arg8[%c0_25, %c0_26] : memref<8x256xf32, #tpu.memory_space<vmem>>, vector<8x256xf32>
    %c0_27 = arith.constant 0 : index
    %c0_28 = arith.constant 0 : index
    %c0_29 = arith.constant 0 : index
    %29 = vector.load %arg3[%c0_27, %c0_28, %c0_29] : memref<3x8x8xf32, #tpu.memory_space<vmem>>, vector<1x8x8xf32>
    %30 = vector.shape_cast %29 : vector<1x8x8xf32> to vector<8x8xf32>
    %31 = vector.extract_strided_slice %28 {offsets = [0, 124], sizes = [8, 128], strides = [1, 1]} : vector<8x256xf32> to vector<8x128xf32>
    %cst_30 = arith.constant dense<0.000000e+00> : vector<8x128xf32>
    %32 = tpu.matmul %30, %31, %cst_30 {dimension_numbers = #tpu.dot_dimension_numbers<[1], [0], [0], [1], [0, 0, 1, 1], [], []>} : vector<8x8xf32>, vector<8x128xf32>, vector<8x128xf32> -> vector<8x128xf32>
    %c1_31 = arith.constant 1 : index
    %c0_32 = arith.constant 0 : index
    %c0_33 = arith.constant 0 : index
    %33 = vector.load %arg3[%c1_31, %c0_32, %c0_33] : memref<3x8x8xf32, #tpu.memory_space<vmem>>, vector<1x8x8xf32>
    %34 = vector.shape_cast %33 : vector<1x8x8xf32> to vector<8x8xf32>
    %35 = vector.extract_strided_slice %28 {offsets = [0, 126], sizes = [8, 128], strides = [1, 1]} : vector<8x256xf32> to vector<8x128xf32>
    %cst_34 = arith.constant dense<0.000000e+00> : vector<8x128xf32>
    %36 = tpu.matmul %34, %35, %cst_34 {dimension_numbers = #tpu.dot_dimension_numbers<[1], [0], [0], [1], [0, 0, 1, 1], [], []>} : vector<8x8xf32>, vector<8x128xf32>, vector<8x128xf32> -> vector<8x128xf32>
    %37 = arith.addf %32, %36 : vector<8x128xf32>
    %c2_35 = arith.constant 2 : index
    %c0_36 = arith.constant 0 : index
    %c0_37 = arith.constant 0 : index
    %38 = vector.load %arg3[%c2_35, %c0_36, %c0_37] : memref<3x8x8xf32, #tpu.memory_space<vmem>>, vector<1x8x8xf32>
    %39 = vector.shape_cast %38 : vector<1x8x8xf32> to vector<8x8xf32>
    %40 = vector.extract_strided_slice %28 {offsets = [0, 128], sizes = [8, 128], strides = [1, 1]} : vector<8x256xf32> to vector<8x128xf32>
    %cst_38 = arith.constant dense<0.000000e+00> : vector<8x128xf32>
    %41 = tpu.matmul %39, %40, %cst_38 {dimension_numbers = #tpu.dot_dimension_numbers<[1], [0], [0], [1], [0, 0, 1, 1], [], []>} : vector<8x8xf32>, vector<8x128xf32>, vector<8x128xf32> -> vector<8x128xf32>
    %42 = arith.addf %37, %41 : vector<8x128xf32>
    %c1_39 = arith.constant 1 : index
    %c0_40 = arith.constant 0 : index
    %c0_41 = arith.constant 0 : index
    %43 = vector.load %arg5[%c1_39, %c0_40, %c0_41] : memref<3x8x1xf32, #tpu.memory_space<vmem>>, vector<1x8x1xf32>
    %44 = vector.shape_cast %43 : vector<1x8x1xf32> to vector<8x1xf32>
    %45 = vector.broadcast %44 : vector<8x1xf32> to vector<8x128xf32>
    %46 = arith.addf %42, %45 : vector<8x128xf32>
    %cst_42 = arith.constant 0.000000e+00 : f32
    %47 = vector.broadcast %cst_42 : f32 to vector<8x128xf32>
    %48 = arith.maximumf %46, %47 : vector<8x128xf32>
    %c0_43 = arith.constant 0 : index
    %c0_44 = arith.constant 0 : index
    %49 = vector.load %arg4[%c0_43, %c0_44] : memref<8x4xf32, #tpu.memory_space<vmem>>, vector<8x4xf32>
    %cst_45 = arith.constant dense<0.000000e+00> : vector<8x128xf32>
    %50 = tpu.matmul %49, %0, %cst_45 {dimension_numbers = #tpu.dot_dimension_numbers<[1], [0], [0], [1], [0, 0, 1, 1], [], []>} : vector<8x4xf32>, vector<4x128xf32>, vector<8x128xf32> -> vector<8x128xf32>
    %c2_46 = arith.constant 2 : index
    %c0_47 = arith.constant 0 : index
    %c0_48 = arith.constant 0 : index
    %51 = vector.load %arg5[%c2_46, %c0_47, %c0_48] : memref<3x8x1xf32, #tpu.memory_space<vmem>>, vector<1x8x1xf32>
    %52 = vector.shape_cast %51 : vector<1x8x1xf32> to vector<8x1xf32>
    %53 = vector.broadcast %52 : vector<8x1xf32> to vector<8x128xf32>
    %54 = arith.addf %50, %53 : vector<8x128xf32>
    %55 = arith.addf %48, %54 : vector<8x128xf32>
    %cst_49 = arith.constant 0.000000e+00 : f32
    %56 = vector.broadcast %cst_49 : f32 to vector<8x128xf32>
    %57 = arith.maximumf %55, %56 : vector<8x128xf32>
    %c0_50 = arith.constant 0 : index
    %c0_51 = arith.constant 0 : index
    %58 = vector.load %arg6[%c0_50, %c0_51] : memref<8x128xf32, #tpu.memory_space<vmem>>, vector<8x128xf32>
    tpu.vector_store %arg6[%c0_50, %c0_51], %57 {strides = array<i32>} : memref<8x128xf32, #tpu.memory_space<vmem>>, vector<8x128xf32>,
    return
  }
  func.func @transform_0(%arg0: i32) -> (i32, i32) {
    %c0_i32 = arith.constant 0 : i32
    %c0_i32_0 = arith.constant 0 : i32
    return %c0_i32, %arg0 : i32, i32
  }
  func.func @transform_1(%arg0: i32) -> (i32, i32, i32) {
    %c0_i32 = arith.constant 0 : i32
    %c0_i32_0 = arith.constant 0 : i32
    %c0_i32_1 = arith.constant 0 : i32
    %c0_i32_2 = arith.constant 0 : i32
    return %c0_i32, %c0_i32_0, %c0_i32_1 : i32, i32, i32
  }
  func.func @transform_2(%arg0: i32) -> (i32, i32, i32) {
    %c0_i32 = arith.constant 0 : i32
    %c0_i32_0 = arith.constant 0 : i32
    %c0_i32_1 = arith.constant 0 : i32
    %c0_i32_2 = arith.constant 0 : i32
    return %c0_i32, %c0_i32_0, %c0_i32_1 : i32, i32, i32
  }
  func.func @transform_3(%arg0: i32) -> (i32, i32) {
    %c0_i32 = arith.constant 0 : i32
    %c0_i32_0 = arith.constant 0 : i32
    %c0_i32_1 = arith.constant 0 : i32
    return %c0_i32, %c0_i32_0 : i32, i32
  }
  func.func @transform_4(%arg0: i32) -> (i32, i32, i32) {
    %c0_i32 = arith.constant 0 : i32
    %c0_i32_0 = arith.constant 0 : i32
    %c0_i32_1 = arith.constant 0 : i32
    %c0_i32_2 = arith.constant 0 : i32
    return %c0_i32, %c0_i32_0, %c0_i32_1 : i32, i32, i32
  }
  func.func @transform_5(%arg0: i32) -> (i32, i32) {
    %c0_i32 = arith.constant 0 : i32
    %c0_i32_0 = arith.constant 0 : i32
    return %c0_i32, %arg0 : i32, i32
  }
}

</mosaic_0001>

<bundles_post_ra>
// kernel: temporal_block.1
= control target key start
LH: loop header
LB: loop body
LE: loop exit
PB: predicated region body
PF: predicated region fallthrough
CT: control target
= control target key end

     0   :  { %s621_s18 = smov 0   ;;  %s693_s0 = inlined_call_operand.vmem [shape: f32[4,256], index: 0, kind: input, shape index: {}]   ;;  %s694_s1 = inlined_call_operand.vmem [shape: f32[3,8,4], index: 1, kind: input, shape index: {}]   ;;  %s695_s2 = inlined_call_operand.vmem [shape: f32[3,8,8], index: 2, kind: input, shape index: {}]   ;;  %s696_s3 = inlined_call_operand.vmem [shape: f32[8,4], index: 3, kind: input, shape index: {}]   ;;  %s697_s4 = inlined_call_operand.vmem [shape: f32[3,8,1], index: 4, kind: input, shape index: {}]   ;;  %s698_s5 = inlined_call_operand.vmem [shape: f32[8,256], index: 5, kind: output, shape index: {}]  }
   0x1 LB: > { %s528_s19 = sadd.s32 4294967295, %s585_s18   ;;  %p532_p0 = scmp.ge.s32.totalorder %s585_s18, 1  ;;  %s585_s18 = sphi %s621_s18, %s15_s18  }
   0x2   : > { %p186_p1 = scmp.lt.s32.totalorder %s585_s18, 3 }
   0x4   : > { %p187_p2 = pnand %p532_p0, %p186_p1 }
   0x5   : > { %p212_p3 = scmp.lt.s32.totalorder (!%p187_p2), %s528_s19, 1  ;;  %s588_s24 = smov (!%p187_p2), 2  }
   0x6   : > { %190 = sbr.rel (%p187_p2) target bundleno = 558 (0x22e), region = 40  ;;  %s589_s25 = smov (!%p187_p2), 4  }
   0xb   : > { %v587_v0 = vmov 0.0   ;;  %s700_s19 = smov (!%p212_p3, %s528_s19), 1  ;;  %vm241_vm0 = vcmask 1043456   ;;  %vm237_vm1 = vcmask 31744   ;;  %v540_v8 = vld [vmem:[%s694_s1 + $0x10] sm:$0xff]  ;;  %v327_v9 = vld [vmem:[%s697_s4] sm:$0xff] }
   0xc   : > { %221 = vst [vmem:[#allocation2] sm:$0xf] %v587_v0  ;;  %s533_s20 = sshll.u32 %s700_s19, 2  ;;  %v438_v10 = vld [vmem:[%s696_s3] sm:$0xff]  ;;  %v590_v11 = vmov 0   ;;  %vm235_vm2 = vcmask 15360  }
   0xd   : > { %s215_s23 = scalar_lea.vmem %s693_s0, %s533_s20  ;;  %566 = vset.pattern.permute.xlu2 %v590_v11  ;;  %577 = vset.pattern.permute.xlu1 %v590_v11  ;;  %v535_v15 = vld [vmem:[%s694_s1 + $0x8] sm:$0xff]  ;;  %v224_v18 = vld [vmem:[%s694_s1] sm:$0xff]  ;;  %v549_v29 = vld [vmem:[%s697_s4 + $0x10] sm:$0xff]  ;;  %vm350_vm3 = vcmask 64512  }
   0xe   : > { %v220_v1 = vld [vmem:[%s215_s23] sm:$0xf]  ;;  %330 = vperm.xlu2 %566, %v327_v9   ;;  %578 = vset.pattern.permute.xlu0 %v590_v11  ;;  %v546_v30 = vld [vmem:[%s695_s2 + $0x10] sm:$0xff]  ;;  %v548_v31 = vld [vmem:[%s697_s4 + $0x8] sm:$0xff]  ;;  %s534_s23 = sshll.u32 %s700_s19, 3 }
   0xf   : > { %222 = vst [vmem:[#allocation2 + $0x4] sm:$0xf] %v220_v1  ;;  %v543_v35 = vld [vmem:[%s695_s2 + $0x8] sm:$0xff]  ;;  %v339_v40 = vld [vmem:[%s695_s2] sm:$0xff]  ;;  %s219_s26 = scalar_lea.vmem %s698_s5, %s534_s23 }
  0x16   : > { %v223_v2 = vld [vmem:[#allocation2] sm:$0xff] }
  0x17   : > { %228 = vst [vmem:[#allocation1] ss:$2 sm:$0xff] %v223_v2 }
  0x1e   : > { %v229_v3 = vld.sshfl [vmem:[#allocation1] sm:$0xff pattern:$0x75316420]  ;;  %v230_v4 = vld.sshfl [vmem:[#allocation1 + $0x8] sm:$0xff pattern:$0x75316420] }
  0x1f   : > { %231 = vrot.lane.b32.xlu0 %v229_v3, %s588_s24  ;;  %264 = vst [vmem:[#allocation1] ss:$2 sm:$0xff] %v223_v2 }
  0x26   : > { %v265_v5 = vld.sshfl [vmem:[#allocation1] sm:$0xff pattern:$0x75316420]  ;;  %v266_v6 = vld.sshfl [vmem:[#allocation1 + $0x8] sm:$0xff pattern:$0x75316420] }
  0x27   : > { %233 = vrot.lane.b32.xlu0 %v230_v4, %s588_s24  ;;  %267 = vrot.lane.b32.xlu1 %v265_v5, %s589_s25  ;;  %299 = vst [vmem:[#allocation1] ss:$2 sm:$0xff] %v223_v2 }
  0x2e   : > { %v300_v7 = vld.sshfl [vmem:[#allocation1 + $0x8] sm:$0xff pattern:$0x75316420] }
  0x2f   : > { %269 = vrot.lane.b32.xlu1 %v266_v6, %s589_s25  ;;  %541 = vmatpush.msk.msra.mxu2 %vm241_vm0, %v300_v7 }
  0x30   : > { %542 = vmatmul.msk.f32.vlgmr.msra.gmra.mxu2 %vm237_vm1, %v540_v8 }
  0x31   : > { %550 = vmatpush.msk.msrb.mxu2 %vm241_vm0, %v220_v1 }
  0x37   : > { %433 = vperm.xlu1 %577, %v548_v31  }
  0x38   : > { %551 = vmatmul.msk.f32.vlgmr.msrb.gmra.mxu2 %vm237_vm1, %v438_v10 }
  0x68   : > { %v331_v24 = vpop.permute.xlu2 %330 }
  0x91   : > { %v232_v12 = vpop.permute.xlu0 %231 }
  0x99   : > { %v234_v13 = vpop.permute.xlu0 %233  ;;  %v268_v14 = vpop.permute.xlu1 %267 }
  0x9a   : > { %v236_v16 = vsel %vm235_vm2, %v232_v12, %v234_v13 }
  0x9b   : > { %536 = vmatpush.msk.msra.mxu0 %vm241_vm0, %v236_v16 }
  0x9c   : > { %537 = vmatmul.msk.f32.vlgmr.msra.gmra.mxu0 %vm237_vm1, %v535_v15 }
  0xa1   : > { %v270_v17 = vpop.permute.xlu1 %269 }
  0xa2   : > { %v271_v19 = vsel %vm237_vm1, %v268_v14, %v270_v17 }
  0xa3   : > { %538 = vmatpush.msk.msra.mxu1 %vm241_vm0, %v271_v19 }
  0xa4   : > { %539 = vmatmul.msk.f32.vlgmr.msra.gmra.mxu1 %vm237_vm1, %v224_v18 }
  0xa9   : > { %v434_v46 = vpop.permute.xlu1 %433 }
  0xb3   : > { %v323_v22 = vpop.f32.mrf.mxu2 }
  0xbb   : > { %v469_v48 = vpop.f32.mrf.mxu2 }
 0x119   : > { %v261_v20 = vpop.f32.mrf.mxu0 }
 0x121   : > { %v294_v21 = vpop.f32.mrf.mxu1 }
 0x122   : > { %v295_v23 = vadd.f32 %v294_v21, %v261_v20 }
 0x124   : > { %v326_v25 = vadd.f32 %v323_v22, %v295_v23 }
 0x126   : > { %v333_v26 = vadd.f32 %v331_v24, %v326_v25 }
 0x128   : > { %v334_v27 = vmax.f32 %v333_v26, 0.0 }
 0x12a   : > { %423 = vmatpush.msrb.mxu1 %v334_v27  ;;  %v572_v28 = vpack.i.bf16 %v334_v27, %v587_v0 }
 0x12b   : > { %547 = vmatmul.msk.f32.vlgmr.msrb.gmra.mxu1 %vm350_vm3, %v546_v30 }
 0x12c   : > { %573 = vrot.lane.b32.xlu0 %v572_v28, %s589_s25  ;;  %568 = vrot.lane.b32.xlu2 %v572_v28, %s588_s24 }
 0x134   : > { %443 = vperm.xlu2 %566, %v549_v29  }
 0x186   : > { %v569_v32 = vpop.permute.xlu2 %568 }
 0x187   : > { %v571_v33 = vunpack.i.h.bf16 %v569_v32  ;;  %v570_v34 = vunpack.i.l.bf16 %v569_v32 }
 0x189   : > { %v348_v36 = vsel %vm235_vm2, %v570_v34, %v571_v33 }
 0x18a   : > { %369 = vmatpush.msra.mxu3 %v348_v36 }
 0x18b   : > { %544 = vmatmul.msk.f32.vlgmr.msra.gmra.mxu3 %vm350_vm3, %v543_v35 }
 0x18e   : > { %v444_v49 = vpop.permute.xlu2 %443 }
 0x18f   : > { %v470_v51 = vadd.f32 %v469_v48, %v444_v49 }
 0x19e   : > { %v574_v37 = vpop.permute.xlu0 %573 }
 0x19f   : > { %v576_v38 = vunpack.i.h.bf16 %v574_v37  ;;  %v575_v39 = vunpack.i.l.bf16 %v574_v37 }
 0x1a1   : > { %v378_v41 = vsel %vm237_vm1, %v575_v39, %v576_v38 }
 0x1a2   : > { %398 = vmatpush.msrb.mxu0 %v378_v41 }
 0x1a3   : > { %545 = vmatmul.msk.f32.vlgmr.msrb.gmra.mxu0 %vm350_vm3, %v339_v40 }
 0x1a8   : > { %v425_v44 = vpop.f32.mrf.mxu1 }
 0x20e   : > { %v371_v42 = vpop.f32.mrf.mxu3 }
 0x220   : > { %v400_v43 = vpop.f32.mrf.mxu0 }
 0x221   : > { %v401_v45 = vadd.f32 %v400_v43, %v371_v42 }
 0x223   : > { %v428_v47 = vadd.f32 %v425_v44, %v401_v45 }
 0x225   : > { %v436_v50 = vadd.f32 %v434_v46, %v428_v47 }
 0x227   : > { %v437_v52 = vmax.f32 %v436_v50, 0.0 }
 0x229   : > { %v472_v53 = vadd.f32 %v470_v51, %v437_v52 }
 0x22b   : > { %v473_v54 = vmax.f32 %v472_v53, 0.0 }
 0x22d   : > { %474 = vst [vmem:[%s219_s26] sm:$0xff] %v473_v54 }
 0x22e PF: > { %s15_s18 = sadd.s32 1, %s585_s18  }
 0x22f   : > { %p12_p4 = scmp.ge.s32.totalorder %s15_s18, 4  }
 0x231   :  { %14 = sbr.rel (!%p12_p4) target bundleno = 1 (0x1), region = 76 }

</bundles_post_ra>
